<compile_context>
chip_gen: v6e
topology: v6e:2x2x1
jax: 0.10.0
libtpu: 0.0.40
codegen_flags: <defaults>
</compile_context>

<pallas_src>
import functools
import math

import jax
import jax.numpy as jnp
from jax.experimental import pallas as pl
from jax.experimental.pallas import tpu as pltpu


# ---------------------------------------------------------------------------
# helpers
# ---------------------------------------------------------------------------
def _ceil_div(a, b):
    return -(-a // b)


def _round_up(a, b):
    return _ceil_div(a, b) * b


def _vmem_limit_bytes():
    """Generation-aware VMEM budget with headroom (v5e/v6e: 64 MiB, v7x: 32 MiB)."""
    cap = None
    try:
        cap = getattr(pltpu.get_tpu_info(), "vmem_capacity_bytes", None)
    except Exception:
        cap = None
    if not cap:
        cap = 64 * 1024 * 1024  # conservative default (== v7x physical per-core VMEM)
    return int(max(16 * 1024 * 1024, min(cap // 2, 100 * 1024 * 1024)))


def _pick_hw_tile(hwf, rows, vmem_limit, max_block_bytes=None, dtype_bytes=4):
    """Lane-tile size: largest multiple of 128 fitting the per-block VMEM budget (<=16K lanes)."""
    rows_pad = _round_up(max(rows, 1), 8)
    budget = min(vmem_limit // 6, 8 * 1024 * 1024)        # pass-2 double-buffers x and y
    if max_block_bytes is not None:
        budget = min(budget, max_block_bytes)
    budget = max(budget, rows_pad * 128 * dtype_bytes)    # at least one 128-lane stripe
    max_lanes = min(budget // (rows_pad * dtype_bytes), 16384)
    max_lanes = max(max_lanes, 128)
    if hwf <= max_lanes:
        return hwf                                        # single tile (full last dim is legal)
    return max((max_lanes // 128) * 128, 128)


# ---------------------------------------------------------------------------
# Fast path: fully-resident single-pass BN (stats + normalize, one read of x)
# ---------------------------------------------------------------------------
def _fused_kernel(gamma_ref, beta_ref, x_ref, o_ref, mean_ref, var_ref, *, total):
    xb = x_ref[...].astype(jnp.float32)                        # (N, C, HW)
    s = jnp.sum(jnp.sum(xb, axis=2, keepdims=True), axis=0)    # (C, 1)
    q = jnp.sum(jnp.sum(xb * xb, axis=2, keepdims=True), axis=0)
    mean = s / total
    denom = max(total - 1, 1)                                  # unbiased variance (ddof=1)
    var = jnp.maximum((q - s * s / total) / denom, 0.0)
    inv_std = jax.lax.rsqrt(jnp.maximum(var, 1e-6))
    scale = gamma_ref[0] * inv_std                             # (C, 1)
    bias = beta_ref[0] - mean * scale
    o_ref[...] = (xb * scale[None] + bias[None]).astype(o_ref.dtype)
    mean_ref[...] = mean
    var_ref[...] = var


# ---------------------------------------------------------------------------
# Two-pass path, pass 1: per-(batch-row, channel-row) sum / sumsq partials
# ---------------------------------------------------------------------------
def _stats_kernel(x_ref, sum_ref, sq_ref, acc_s, acc_q, *, hwf, t_hw, lane_w):
    # x_ref: (1, R, t_hw) tile; sum_ref / sq_ref: (1, R, 1) per-i partial outputs
    # acc_s / acc_q: lane-dense (R, lane_w) VMEM scratch accumulators (per-core)
    j = pl.program_id(1)
    nj = pl.num_programs(1)

    @pl.when(j == 0)
    def _():
        acc_s[...] = jnp.zeros_like(acc_s)
        acc_q[...] = jnp.zeros_like(acc_q)

    xb = x_ref[0].astype(jnp.float32)                          # (R, t_hw)
    if hwf % t_hw != 0:
        # ragged tail: mask lanes past the true HW bound (OOB block contents are undefined)
        lane = jax.lax.broadcasted_iota(jnp.int32, xb.shape, 1)
        xb = jnp.where(lane < (hwf - j * t_hw), xb, 0.0)

    # Pure VALU, lane-parallel accumulation into the wide scratch (no per-step XLU reduce,
    # no per-step 1-lane masked stores).
    s = acc_s[...]
    q = acc_q[...]
    for cidx in range(t_hw // lane_w):
        chunk = xb[:, cidx * lane_w:(cidx + 1) * lane_w]
        s = s + chunk
        q = q + chunk * chunk
    acc_s[...] = s
    acc_q[...] = q

    @pl.when(j == nj - 1)
    def _():
        # single cross-lane reduce per batch row; written once -> megacore-safe ('parallel' i)
        sum_ref[0] = jnp.sum(acc_s[...], axis=1, keepdims=True)
        sq_ref[0] = jnp.sum(acc_q[...], axis=1, keepdims=True)


# ---------------------------------------------------------------------------
# Two-pass path, pass 2: elementwise normalize with gamma folded into the scale
# ---------------------------------------------------------------------------
def _norm_kernel(scale_ref, bias_ref, x_ref, o_ref):
    # scale_ref / bias_ref: (R, 1); x_ref / o_ref: (1, R, t_hw)
    xb = x_ref[0].astype(jnp.float32)
    o_ref[0] = (xb * scale_ref[...] + bias_ref[...]).astype(o_ref.dtype)


# ---------------------------------------------------------------------------
# Wrapper
# ---------------------------------------------------------------------------
def custom_batch_norm_forward(x_nchw, gamma, beta, running_mean, running_var,
                              momentum=0.1, first_pass=True,
                              _max_block_bytes=None, _force_two_pass=False):
    """Training-mode forward of CustomBatchNorm.

    x_nchw: (N, C, H, W); gamma, beta: (1,).
    Returns (y_nchw, new_running_mean, new_running_var).
    """
    n, c, h, w = x_nchw.shape
    hw = h * w
    total = n * hw
    vmem_limit = _vmem_limit_bytes()

    c_pad = _round_up(c, 8)
    resident_f32_bytes = n * c_pad * hw * 4
    use_fused = (not _force_two_pass) and (4 * resident_f32_bytes <= vmem_limit // 2)

    if use_fused:
        # ---- single-pass fused path (one HBM read of x, one write of y) ----------------
        x3d = x_nchw.reshape(n, c, hw)                       # free contiguous reshape
        gamma_s = gamma.astype(jnp.float32).reshape(1)
        beta_s = beta.astype(jnp.float32).reshape(1)
        y3d, mean_c1, var_c1 = pl.pallas_call(
            functools.partial(_fused_kernel, total=total),
            out_shape=(
                jax.ShapeDtypeStruct((n, c, hw), x_nchw.dtype),
                jax.ShapeDtypeStruct((c, 1), jnp.float32),
                jax.ShapeDtypeStruct((c, 1), jnp.float32),
            ),
            in_specs=[
                pl.BlockSpec(memory_space=pltpu.MemorySpace.SMEM),
                pl.BlockSpec(memory_space=pltpu.MemorySpace.SMEM),
                pl.BlockSpec(memory_space=pltpu.MemorySpace.VMEM),
            ],
            out_specs=(
                pl.BlockSpec(memory_space=pltpu.MemorySpace.VMEM),
                pl.BlockSpec(memory_space=pltpu.MemorySpace.VMEM),
                pl.BlockSpec(memory_space=pltpu.MemorySpace.VMEM),
            ),
            compiler_params=pltpu.CompilerParams(vmem_limit_bytes=vmem_limit),
        )(gamma_s, beta_s, x3d)
        mean = mean_c1[:, 0]
        var = var_c1[:, 0]
        y_nchw = y3d.reshape(n, c, h, w)
    else:
        # ---- two-pass tiled path -------------------------------------------------------
        # Sublane packing: fold part of HW into the channel dim when C % 8 != 0 (f32).
        # TODO(synk): use a fold of 16 for 16-bit inputs (bf16 packs 16 rows per vreg).
        fold = 1
        if c % 8 != 0:
            need = 8 // math.gcd(c, 8)
            if hw % need == 0:
                fold = need
        r = c * fold
        hwf = hw // fold
        x_fold = x_nchw.reshape(n, r, hwf)                   # free contiguous reshape

        t_hw = _pick_hw_tile(hwf, r, vmem_limit, _max_block_bytes)
        n_j = _ceil_div(hwf, t_hw)
        lane_w = 512 if t_hw % 512 == 0 else (128 if t_hw % 128 == 0 else t_hw)

        # pass 1: per-batch-row partial sums (N axis 'parallel' -> v7x megacore-safe)
        sum_nr1, sq_nr1 = pl.pallas_call(
            functools.partial(_stats_kernel, hwf=hwf, t_hw=t_hw, lane_w=lane_w),
            out_shape=(
                jax.ShapeDtypeStruct((n, r, 1), jnp.float32),
                jax.ShapeDtypeStruct((n, r, 1), jnp.float32),
            ),
            grid=(n, n_j),
            in_specs=[pl.BlockSpec((1, r, t_hw), lambda i, j: (i, 0, j))],
            out_specs=(
                pl.BlockSpec((1, r, 1), lambda i, j: (i, 0, 0)),
                pl.BlockSpec((1, r, 1), lambda i, j: (i, 0, 0)),
            ),
            scratch_shapes=[
                pltpu.VMEM((r, lane_w), jnp.float32),
                pltpu.VMEM((r, lane_w), jnp.float32),
            ],
            compiler_params=pltpu.CompilerParams(
                dimension_semantics=("parallel", "arbitrary"),
                vmem_limit_bytes=vmem_limit,
            ),
        )(x_fold)

        # tiny O(N*C*fold) combine + finalize in the wrapper
        ch_sum = jnp.sum(sum_nr1[:, :, 0], axis=0).reshape(c, fold).sum(axis=1)
        ch_sq = jnp.sum(sq_nr1[:, :, 0], axis=0).reshape(c, fold).sum(axis=1)
        mean = ch_sum / total
        denom = max(total - 1, 1)                            # unbiased variance (ddof=1)
        # TODO(synk): single-pass E[x^2]-E[x]^2 can lose precision for huge N*H*W with large
        # means; switch to a shifted/Welford accumulation if tighter tolerances are needed.
        var = jnp.maximum((ch_sq - ch_sum * ch_sum / total) / denom, 0.0)

        inv_std = jax.lax.rsqrt(jnp.maximum(var, 1e-6))
        scale = gamma[0].astype(jnp.float32) * inv_std       # (C,)
        bias = beta[0].astype(jnp.float32) - mean * scale    # (C,)
        scale_r = jnp.repeat(scale, fold)[:, None].astype(jnp.float32)   # (R, 1)
        bias_r = jnp.repeat(bias, fold)[:, None].astype(jnp.float32)     # (R, 1)

        # pass 2: normalize (both axes 'parallel'; ragged-tail writes are clipped by Pallas)
        y_fold = pl.pallas_call(
            _norm_kernel,
            out_shape=jax.ShapeDtypeStruct((n, r, hwf), x_nchw.dtype),
            grid=(n, n_j),
            in_specs=[
                pl.BlockSpec((r, 1), lambda i, j: (0, 0)),
                pl.BlockSpec((r, 1), lambda i, j: (0, 0)),
                pl.BlockSpec((1, r, t_hw), lambda i, j: (i, 0, j)),
            ],
            out_specs=pl.BlockSpec((1, r, t_hw), lambda i, j: (i, 0, j)),
            compiler_params=pltpu.CompilerParams(
                dimension_semantics=("parallel", "parallel"),
                vmem_limit_bytes=vmem_limit,
            ),
        )(scale_r, bias_r, x_fold)
        y_nchw = y_fold.reshape(n, c, h, w)

    # Running-stat update: O(C) wrapper glue (negligible vs the HBM-bound kernels).
    if first_pass:
        new_running_mean = running_mean + mean
        new_running_var = running_var + var
    else:
        new_running_mean = (1.0 - momentum) * running_mean + momentum * mean
        new_running_var = (1.0 - momentum) * running_var + momentum * var

    return y_nchw, new_running_mean, new_running_var


# ---------------------------------------------------------------------------
# Pure-JAX reference of the same math (matches the PyTorch module)
# ---------------------------------------------------------------------------
def _reference_forward(x, gamma, beta):
    c = x.shape[1]
    x2d = jnp.transpose(x, (1, 0, 2, 3)).reshape(c, -1)
    mean = jnp.mean(x2d, axis=1)
    var = jnp.var(x2d, axis=1, ddof=1)
    mean_b = mean[None, :, None, None]
    var_b = var[None, :, None, None]
    y = gamma[0] * (x - mean_b) / jnp.sqrt(jnp.maximum(var_b, 1e-6)) + beta[0]
    return y, mean, var


if __name__ == "__main__":
    key = jax.random.PRNGKey(0)
    k1, k2, k3, kg = jax.random.split(key, 4)

    # deterministic parameters matching the module's __init__ shapes
    gamma = jax.random.uniform(kg, (1,), dtype=jnp.float32)   # uniform_(torch.empty(1))
    beta = jnp.zeros((1,), dtype=jnp.float32)

    # Case 1: small activation -> fully-resident single-pass fused kernel.
    N, C, H, W = 2, 4, 16, 16
    x1 = jax.random.normal(k1, (N, C, H, W), dtype=jnp.float32)
    rm0 = jnp.zeros((C,), jnp.float32)
    rv0 = jnp.zeros((C,), jnp.float32)
    y1, rm1, rv1 = custom_batch_norm_forward(x1, gamma, beta, rm0, rv0,
                                             momentum=0.1, first_pass=True)
    jax.block_until_ready((y1, rm1, rv1))
    y_ref1, m_ref1, v_ref1 = _reference_forward(x1, gamma, beta)
    assert jnp.allclose(y1, y_ref1, atol=1e-4, rtol=1e-4), "case1 output mismatch"
    assert jnp.allclose(rm1, m_ref1, atol=1e-4, rtol=1e-4), "case1 running_mean mismatch"
    assert jnp.allclose(rv1, v_ref1, atol=1e-4, rtol=1e-4), "case1 running_var mismatch"

    # Case 2: forced two-pass path, ragged HW tail (tests iota masking + sublane fold, C=4).
    x2 = jax.random.normal(k2, (2, 4, 18, 18), dtype=jnp.float32)
    y2, rm2, rv2 = custom_batch_norm_forward(
        x2, gamma, beta, rm0, rv0, momentum=0.1, first_pass=True,
        _force_two_pass=True, _max_block_bytes=8 * 128 * 4)
    jax.block_until_ready((y2, rm2, rv2))
    y_ref2, m_ref2, v_ref2 = _reference_forward(x2, gamma, beta)
    assert jnp.allclose(y2, y_ref2, atol=1e-4, rtol=1e-4), "case2 output mismatch"
    assert jnp.allclose(rm2, m_ref2, atol=1e-4, rtol=1e-4), "case2 running_mean mismatch"
    assert jnp.allclose(rv2, v_ref2, atol=1e-4, rtol=1e-4), "case2 running_var mismatch"

    # Case 3: two-pass path, C multiple of 8, multi-chunk lane accumulation, momentum blend.
    C3 = 8
    x3 = jax.random.normal(k3, (2, C3, 32, 64), dtype=jnp.float32)
    rm3_prev = jnp.arange(C3, dtype=jnp.float32) * 0.1
    rv3_prev = jnp.ones((C3,), jnp.float32)
    y3, rm3, rv3 = custom_batch_norm_forward(
        x3, gamma, beta, rm3_prev, rv3_prev, momentum=0.1, first_pass=False,
        _force_two_pass=True, _max_block_bytes=8 * 1024 * 4)
    jax.block_until_ready((y3, rm3, rv3))
    y_ref3, m_ref3, v_ref3 = _reference_forward(x3, gamma, beta)
    assert jnp.allclose(y3, y_ref3, atol=1e-4, rtol=1e-4), "case3 output mismatch"
    assert jnp.allclose(rm3, 0.9 * rm3_prev + 0.1 * m_ref3, atol=1e-4, rtol=1e-4), \
        "case3 running_mean mismatch"
    assert jnp.allclose(rv3, 0.9 * rv3_prev + 0.1 * v_ref3, atol=1e-4, rtol=1e-4), \
        "case3 running_var mismatch"

    print("KERNEL_OK")
</pallas_src>

<mosaic_0001>
module attributes {stable_mosaic.version = 11 : i64} {
  func.func @_fused_kernel(%arg0: memref<1xf32, #tpu.memory_space<smem>>, %arg1: memref<1xf32, #tpu.memory_space<smem>>, %arg2: memref<2x4x256xf32, #tpu.memory_space<vmem>>, %arg3: memref<2x4x256xf32, #tpu.memory_space<vmem>>, %arg4: memref<4x1xf32, #tpu.memory_space<vmem>>, %arg5: memref<4x1xf32, #tpu.memory_space<vmem>>) attributes {dimension_semantics = [], scalar_prefetch = 0 : i64, scratch_operands = 0 : i64, tpu.core_type = #tpu.core_type<tc>} {
    %c0 = arith.constant 0 : index
    %c0_0 = arith.constant 0 : index
    %c0_1 = arith.constant 0 : index
    %0 = vector.load %arg2[%c0, %c0_0, %c0_1] : memref<2x4x256xf32, #tpu.memory_space<vmem>>, vector<2x4x256xf32>
    %cst = arith.constant dense<0.000000e+00> : vector<2x4xf32>
    %1 = vector.multi_reduction <add>, %0, %cst [2] : vector<2x4x256xf32> to vector<2x4xf32>
    %2 = vector.shape_cast %1 : vector<2x4xf32> to vector<2x4x1xf32>
    %cst_2 = arith.constant dense<0.000000e+00> : vector<4x1xf32>
    %3 = vector.multi_reduction <add>, %2, %cst_2 [0] : vector<2x4x1xf32> to vector<4x1xf32>
    %4 = arith.mulf %0, %0 : vector<2x4x256xf32>
    %cst_3 = arith.constant dense<0.000000e+00> : vector<2x4xf32>
    %5 = vector.multi_reduction <add>, %4, %cst_3 [2] : vector<2x4x256xf32> to vector<2x4xf32>
    %6 = vector.shape_cast %5 : vector<2x4xf32> to vector<2x4x1xf32>
    %cst_4 = arith.constant dense<0.000000e+00> : vector<4x1xf32>
    %7 = vector.multi_reduction <add>, %6, %cst_4 [0] : vector<2x4x1xf32> to vector<4x1xf32>
    %cst_5 = arith.constant 5.120000e+02 : f32
    %8 = vector.broadcast %cst_5 : f32 to vector<4x1xf32>
    %9 = arith.divf %3, %8 : vector<4x1xf32>
    %10 = arith.mulf %3, %3 : vector<4x1xf32>
    %cst_6 = arith.constant 5.120000e+02 : f32
    %11 = vector.broadcast %cst_6 : f32 to vector<4x1xf32>
    %12 = arith.divf %10, %11 : vector<4x1xf32>
    %13 = arith.subf %7, %12 : vector<4x1xf32>
    %cst_7 = arith.constant 5.110000e+02 : f32
    %14 = vector.broadcast %cst_7 : f32 to vector<4x1xf32>
    %15 = arith.divf %13, %14 : vector<4x1xf32>
    %cst_8 = arith.constant 0.000000e+00 : f32
    %16 = vector.broadcast %cst_8 : f32 to vector<4x1xf32>
    %17 = arith.maximumf %15, %16 : vector<4x1xf32>
    %cst_9 = arith.constant 9.99999997E-7 : f32
    %18 = vector.broadcast %cst_9 : f32 to vector<4x1xf32>
    %19 = arith.maximumf %17, %18 : vector<4x1xf32>
    %20 = math.rsqrt %19 : vector<4x1xf32>
    %c0_10 = arith.constant 0 : index
    %21 = memref.load %arg0[%c0_10] : memref<1xf32, #tpu.memory_space<smem>>
    %22 = vector.broadcast %21 : f32 to vector<4x1xf32>
    %23 = arith.mulf %22, %20 : vector<4x1xf32>
    %c0_11 = arith.constant 0 : index
    %24 = memref.load %arg1[%c0_11] : memref<1xf32, #tpu.memory_space<smem>>
    %25 = arith.mulf %9, %23 : vector<4x1xf32>
    %26 = vector.broadcast %24 : f32 to vector<4x1xf32>
    %27 = arith.subf %26, %25 : vector<4x1xf32>
    %28 = vector.shape_cast %23 : vector<4x1xf32> to vector<1x4x1xf32>
    %29 = vector.broadcast %28 : vector<1x4x1xf32> to vector<2x4x256xf32>
    %30 = arith.mulf %0, %29 : vector<2x4x256xf32>
    %31 = vector.shape_cast %27 : vector<4x1xf32> to vector<1x4x1xf32>
    %32 = vector.broadcast %31 : vector<1x4x1xf32> to vector<2x4x256xf32>
    %33 = arith.addf %30, %32 : vector<2x4x256xf32>
    %c0_12 = arith.constant 0 : index
    %c0_13 = arith.constant 0 : index
    %c0_14 = arith.constant 0 : index
    %34 = vector.load %arg3[%c0_12, %c0_13, %c0_14] : memref<2x4x256xf32, #tpu.memory_space<vmem>>, vector<2x4x256xf32>
    tpu.vector_store %arg3[%c0_12, %c0_13, %c0_14], %33 {strides = array<i32>} : memref<2x4x256xf32, #tpu.memory_space<vmem>>, vector<2x4x256xf32>,
    %c0_15 = arith.constant 0 : index
    %c0_16 = arith.constant 0 : index
    %35 = vector.load %arg4[%c0_15, %c0_16] : memref<4x1xf32, #tpu.memory_space<vmem>>, vector<4x1xf32>
    tpu.vector_store %arg4[%c0_15, %c0_16], %9 {strides = array<i32>} : memref<4x1xf32, #tpu.memory_space<vmem>>, vector<4x1xf32>,
    %c0_17 = arith.constant 0 : index
    %c0_18 = arith.constant 0 : index
    %36 = vector.load %arg5[%c0_17, %c0_18] : memref<4x1xf32, #tpu.memory_space<vmem>>, vector<4x1xf32>
    tpu.vector_store %arg5[%c0_17, %c0_18], %17 {strides = array<i32>} : memref<4x1xf32, #tpu.memory_space<vmem>>, vector<4x1xf32>,
    return
  }
}

</mosaic_0001>

<bundles_post_ra>
// kernel: tpu_custom_call.1
= control target key start
LH: loop header
LB: loop body
LE: loop exit
PB: predicated region body
PF: predicated region fallthrough
CT: control target
= control target key end

     0   :  { %13 = vsyncpa [#allocation5], 0  ;;  %s270_s0 = inlined_call_operand.<no memory space> [shape: f32[1], index: 0, kind: input, shape index: {}]   ;;  %s271_s1 = inlined_call_operand.<no memory space> [shape: f32[1], index: 1, kind: input, shape index: {}]   ;;  %s272_s2 = inlined_call_operand.hbm [shape: f32[2,4,256], index: 2, kind: input, shape index: {}]   ;;  %s273_s3 = inlined_call_operand.hbm [shape: f32[2,4,256], index: 3, kind: output, shape index: {0}]   ;;  %s274_s4 = inlined_call_operand.vmem [shape: f32[4,1], index: 4, kind: output, shape index: {1}]   ;;  %s275_s5 = inlined_call_operand.vmem [shape: f32[4,1], index: 5, kind: output, shape index: {2}]  }
   0x1   :  { %14 = vsyncpa [#allocation6], 0  ;;  %s199_s18 = smov [#allocation4]  }
   0x2   :  { %s24_s19 = sshll.u32 %s199_s18, 4  ;;  %s25_s19 = int_to_ptr.vmem [resolvable:$true] %s24_s19 }
   0x3   :  { %s163_s20 = scalar_lea.vmem %s25_s19, 256  ;;  %p168_p1 = scmp.lt.s32.totalorder %s25_s19, %s25_s19 }
   0x4   :  { %p164_p0 = scmp.ne.s32.totalorder %s25_s19, %s163_s20  ;;  %p169_p2 = scmp.lt.s32.totalorder %s163_s20, %s163_s20 }
   0x6   :  { %p170_p3 = por %p169_p2, %p168_p1 }
   0x8   :  { %p171_p4 = pnand %p170_p3, %p164_p0 }
   0xa   :  { %174 = shalt.err (!%p171_p4)
}
   0xb   :  { %s200_s21 = smov 128   ;;  %s201_s22 = smov 8  }
   0xc   :  { %30 = dma.hbm_to_vmem [thread:$0]  %s272_s2, 256, %s25_s19, [#allocation5], %s200_s21, %s200_s21, %s201_s22  }
   0xd   :  { %195 = dma.done.wait [#allocation5], 256  }
   0xe   :  { %196 = vsyncadd [#allocation5], 4294967040  ;;  %vm42_vm0 = vcmask 1043456   ;;  %v34_v0 = vld [vmem:[#allocation4] sm:$0xff]  ;;  %v35_v1 = vld [vmem:[#allocation4 + $0x8] sm:$0xff]  ;;  %vm118_vm1 = vcmask 3072   ;;  %v98_v39 = vlaneseq  ;;  %v88_v42 = vstv %s270_s0 }
   0xf   :  { %v38_v2 = vcombine.high %v34_v0, %v34_v0  ;;  %v43_v3 = vsel %vm42_vm0, %v34_v0, 0.0  ;;  %v56_v4 = vmul.f32 %v34_v0, %v34_v0  ;;  %v39_v5 = vcombine.high %v35_v1, %v35_v1 }
  0x10   :  { %v48_v6 = vsel %vm42_vm0, %v35_v1, 0.0  ;;  %v57_v7 = vmul.f32 %v35_v1, %v35_v1  ;;  %v202_v37 = vmov 839922192   ;;  %v99_v41 = vshrl.u32 %v98_v39, 7 }
  0x11   :  { %v44_v8 = vsel %vm42_vm0, %v38_v2, 0.0  ;;  %v60_v9 = vcombine.high %v56_v4, %v56_v4  ;;  %v64_v10 = vsel %vm42_vm0, %v56_v4, 0.0  ;;  %v49_v11 = vsel %vm42_vm0, %v39_v5, 0.0 }
  0x12   :  { %v45_v12 = vadd.f32 %v44_v8, %v43_v3  ;;  %v61_v13 = vcombine.high %v57_v7, %v57_v7  ;;  %v69_v15 = vsel %vm42_vm0, %v57_v7, 0.0  ;;  %v50_v17 = vadd.f32 %v49_v11, %v48_v6 }
  0x13   :  { %v65_v14 = vsel %vm42_vm0, %v60_v9, 0.0  ;;  %v96_v38 = vunpack.c.l.s4 %v202_v37  ;;  %v92_v46 = vstv %s271_s1 }
  0x14   :  { %46 = vadd.xlane.f32.xlu0 %v45_v12  ;;  %v66_v16 = vadd.f32 %v65_v14, %v64_v10  ;;  %v70_v18 = vsel %vm42_vm0, %v61_v13, 0.0 }
  0x15   :  { %v71_v19 = vadd.f32 %v70_v18, %v69_v15  ;;  %v97_v40 = vunpack.c.0.s8 %v96_v38 }
  0x16   :  { %67 = vadd.xlane.f32.xlu1 %v66_v16 }
  0x17   :  { %v100_v43 = vsub.s32 %v97_v40, %v99_v41 }
  0x18   :  { %51 = vadd.xlane.f32.xlu0 %v50_v17 }
  0x1a   :  { %72 = vadd.xlane.f32.xlu1 %v71_v19 }
  0x9d   :  { %v47_v20 = vpop.xlane.xlu0 %46 }
  0x9e   :  { %v53_v23 = vsel %vm42_vm0, %v47_v20, 0.0 }
  0x9f   :  { %v68_v21 = vpop.xlane.xlu1 %67 }
  0xa0   :  { %v74_v30 = vsel %vm42_vm0, %v68_v21, 0.0 }
  0xa1   :  { %v52_v22 = vpop.xlane.xlu0 %51 }
  0xa2   :  { %v54_v24 = vsel %vm42_vm0, %v52_v22, 0.0 }
  0xa3   :  { %v55_v25 = vadd.f32 %v54_v24, %v53_v23  ;;  %v73_v26 = vpop.xlane.xlu1 %72 }
  0xa4   :  { %v75_v27 = vsel %vm42_vm0, %v73_v26, 0.0 }
  0xa5   :  { %v78_v28 = vmul.f32 0.001953125, %v55_v25  ;;  %v79_v29 = vmul.f32 %v55_v25, %v55_v25  ;;  %v76_v32 = vadd.f32 %v75_v27, %v74_v30 }
  0xa7   :  { %v80_v31 = vmul.f32 0.001953125, %v79_v29  ;;  %119 = vst.msk [vmem:[%s274_s4] sm:$0xf] %vm118_vm1, %v78_v28 }
  0xa9   :  { %v81_v33 = vsub.f32 %v76_v32, %v80_v31 }
  0xab   :  { %v83_v34 = vmul.f32 0.0019569471, %v81_v33 }
  0xad   :  { %v84_v35 = vmax.f32 %v83_v34, 0.0 }
  0xaf   :  { %v85_v36 = vmax.f32 %v84_v35, 1e-06  ;;  %120 = vst.msk [vmem:[%s275_s5] sm:$0xf] %vm118_vm1, %v84_v35  ;;  %s203_s5 = smov [#allocation7]  }
  0xb0   :  { %s126_s6 = sshll.u32 %s203_s5, 4  ;;  %s127_s6 = int_to_ptr.vmem [resolvable:$true] %s126_s6 }
  0xb1   :  { %153 = vrsqrt.f32 %v85_v36  ;;  %s175_s0 = scalar_lea.vmem %s127_s6, 256  ;;  %p180_p6 = scmp.lt.s32.totalorder %s127_s6, %s127_s6 }
  0xb2   :  { %p176_p5 = scmp.ne.s32.totalorder %s127_s6, %s175_s0  ;;  %p181_p7 = scmp.lt.s32.totalorder %s175_s0, %s175_s0 }
  0xb4   :  { %p182_p8 = por %p181_p7, %p180_p6 }
  0xb6   :  { %p183_p9 = pnand %p182_p8, %p176_p5 }
  0xbe   :  { %v154_v44 = vpop.eup %153 }
  0xbf   :  { %v89_v45 = vmul.f32 %v154_v44, %v88_v42 }
  0xc1   :  { %v91_v47 = vmul.f32 %v89_v45, %v78_v28  ;;  %v101_v48 = vrot.slane %v89_v45, %v100_v43 }
  0xc3   :  { %v93_v49 = vsub.f32 %v92_v46, %v91_v47  ;;  %v103_v50 = vmul.f32 %v101_v48, %v34_v0  ;;  %v104_v51 = vmul.f32 %v101_v48, %v35_v1 }
  0xc5   :  { %v112_v52 = vrot.slane %v93_v49, %v100_v43 }
  0xc7   :  { %v114_v53 = vadd.f32 %v112_v52, %v103_v50  ;;  %v115_v54 = vadd.f32 %v112_v52, %v104_v51 }
  0xc9   :  { %116 = vst [vmem:[#allocation7] sm:$0xff] %v114_v53  ;;  %117 = vst [vmem:[#allocation7 + $0x8] sm:$0xff] %v115_v54 }
  0xca   :  { %186 = shalt.err (!%p183_p9)
}
  0xcb   :  { %132 = dma.vmem_to_hbm [thread:$0]  %s127_s6, 256, %s273_s3, [#allocation6], %s200_s21, %s200_s21, %s201_s22  }
  0xcc   :  { %197 = dma.done.wait [#allocation6], 256  }
  0xcd   :  { %198 = vsyncadd [#allocation6], 4294967040 }
  0xce   :  { %144 = vsyncpa [#allocation5], 1 }
  0xcf   :  { %145 = vsyncpa [#allocation6], 1 }

</bundles_post_ra>
